<compile_context>
chip_gen: v7x
topology: tpu7x:2x2x1
jax: 0.10.0
libtpu: 0.0.40
codegen_flags: <defaults>
</compile_context>

<pallas_src>
import functools

import jax
import jax.numpy as jnp
from jax.experimental import pallas as pl
from jax.experimental.pallas import tpu as pltpu


# Conservative budget for the double-buffered in+out pipeline tiles of one
# pallas_call.  Safe on every generation (v5e default scoped VMEM is 16 MiB,
# v6e/v7x 32 MiB) while big enough to sit on the HBM roofline.
_PIPELINE_BUDGET_BYTES = 10 * 1024 * 1024
_VMEM_LIMIT_FLOOR = 32 * 1024 * 1024
_VMEM_LIMIT_CAP = 60 * 1024 * 1024        # stay under v7x's 64 MiB physical


def _vmem_limit(footprint_bytes):
    return int(min(max(_VMEM_LIMIT_FLOOR, footprint_bytes + (4 << 20)),
                   _VMEM_LIMIT_CAP))


def _excite(pooled, w1t_ref, b1_ref, w2t_ref, b2_ref):
    """(1, C) f32 pooled features -> (1, C) f32 gate (conv1x1 - ReLU - conv1x1)."""
    # Weights stay in their native dtype (bf16-friendly); accumulate in f32.
    h = jnp.dot(pooled, w1t_ref[...], preferred_element_type=jnp.float32)
    h = jnp.maximum(h + b1_ref[...].astype(jnp.float32), 0.0)
    y = jnp.dot(h, w2t_ref[...], preferred_element_type=jnp.float32)
    return y + b2_ref[...].astype(jnp.float32)


# ---------------------------------------------------------------------------
# Fused single-pass kernel: one image per grid step.
#   x: (1, C, HW) native dtype -> pool -> excite -> multiply -> out (1, C, HW)
# ---------------------------------------------------------------------------
def _fused_kernel(x_ref, w1t_ref, b1_ref, w2t_ref, b2_ref, o_ref, *, inv_hw):
    xf = x_ref[...].astype(jnp.float32)                        # (1, C, HW)
    pooled = jnp.sum(xf, axis=-1) * inv_hw                     # (1, C)
    gate = _excite(pooled, w1t_ref, b1_ref, w2t_ref, b2_ref)   # (1, C) f32
    o_ref[...] = (xf * gate[:, :, None]).astype(o_ref.dtype)


# ---------------------------------------------------------------------------
# Split path, kernel A: pool with f32 accumulation in the resident output
# block; the excite MLP runs once in the finalize branch (no extra launch).
#   x block: (1, C, T);  gate block: (1, C, 1) f32 (resident across s)
# ---------------------------------------------------------------------------
def _pool_excite_kernel(x_ref, w1t_ref, b1_ref, w2t_ref, b2_ref, y_ref, *,
                        inv_hw):
    s = pl.program_id(1)

    @pl.when(s == 0)
    def _():
        y_ref[...] = jnp.zeros_like(y_ref)

    y_ref[...] += jnp.sum(x_ref[...].astype(jnp.float32), axis=-1,
                          keepdims=True)

    @pl.when(s == pl.num_programs(1) - 1)
    def _():
        pooled = y_ref[...][:, :, 0] * inv_hw                  # (1, C)
        gate = _excite(pooled, w1t_ref, b1_ref, w2t_ref, b2_ref)
        y_ref[...] = gate[:, :, None]


# ---------------------------------------------------------------------------
# Split path, kernel B: pure load-multiply-store broadcast multiply.
#   x block: (1, C, T);  gate block: (1, C, 1) f32;  out block: (1, C, T)
# ---------------------------------------------------------------------------
def _mul_kernel(x_ref, y_ref, o_ref):
    o_ref[...] = (x_ref[...] * y_ref[...]).astype(o_ref.dtype)


def _pick_spatial_tile(hw, c, itemsize, budget=_PIPELINE_BUDGET_BYTES):
    """Largest multiple-of-128 divisor of hw whose in+out double-buffered
    footprint (4 * c * T * itemsize) fits the budget.  Falls back to the
    smallest aligned tile or the full extent (as the (8,128) rule requires)."""
    max_t = budget // max(4 * c * itemsize, 1)
    best = None
    t = 128
    while t <= hw:
        if hw % t == 0 and t <= max_t:
            best = t
        t += 128
    if best is not None:
        return best
    if hw % 128 == 0:
        return 128          # aligned but over budget: bump vmem limit instead
    return hw               # no aligned divisor -> single full-extent block


def se_module(x, w1, b1, w2, b2, *, fuse=None):
    """x: (N, C, H, W); w1: (Cmid, C); b1: (Cmid,); w2: (C, Cmid); b2: (C,)."""
    N, C, H, W = x.shape
    Cmid = w1.shape[0]
    HW = H * W
    itemsize = jnp.dtype(x.dtype).itemsize
    inv_hw = float(1.0 / HW)

    # Lane-dense layout + host-side weight prep (free outside the kernels).
    x3 = x.reshape(N, C, HW)
    w1t = jnp.transpose(w1)              # (C, Cmid)
    w2t = jnp.transpose(w2)              # (Cmid, C)
    b1_2d = b1.reshape(1, Cmid)
    b2_2d = b2.reshape(1, C)

    w_bytes = int((w1t.size + b1_2d.size) * jnp.dtype(w1.dtype).itemsize
                  + (w2t.size + b2_2d.size) * jnp.dtype(w2.dtype).itemsize)

    def weight_specs(grid_rank):
        if grid_rank == 1:
            idx = lambda n: (0, 0)
        else:
            idx = lambda n, s: (0, 0)
        return [
            pl.BlockSpec((C, Cmid), idx),
            pl.BlockSpec((1, Cmid), idx),
            pl.BlockSpec((Cmid, C), idx),
            pl.BlockSpec((1, C), idx),
        ]

    slab_bytes = C * HW * itemsize
    if fuse is None:
        fuse = 4 * slab_bytes + w_bytes <= _PIPELINE_BUDGET_BYTES

    if fuse:
        # -------- single-pass fused kernel: x read once, written once -------
        footprint = 6 * slab_bytes + 2 * w_bytes   # in+out dbl-buf + f32 temp
        out3 = pl.pallas_call(
            functools.partial(_fused_kernel, inv_hw=inv_hw),
            out_shape=jax.ShapeDtypeStruct((N, C, HW), x.dtype),
            grid=(N,),
            in_specs=[pl.BlockSpec((1, C, HW), lambda n: (n, 0, 0))]
                     + weight_specs(1),
            out_specs=pl.BlockSpec((1, C, HW), lambda n: (n, 0, 0)),
            compiler_params=pltpu.CompilerParams(
                dimension_semantics=("parallel",),
                vmem_limit_bytes=_vmem_limit(footprint)),
            cost_estimate=pl.CostEstimate(
                flops=int(N * (2 * C * HW + 4 * C * Cmid)),
                transcendentals=0,
                bytes_accessed=int(2 * N * slab_bytes + w_bytes)),
        )(x3, w1t, b1_2d, w2t, b2_2d)
        return out3.reshape(N, C, H, W)

    # -------- split path: pool+excite, then broadcast multiply --------------
    T = _pick_spatial_tile(HW, C, itemsize)
    S = HW // T
    tile_bytes = C * T * itemsize

    gate = pl.pallas_call(
        functools.partial(_pool_excite_kernel, inv_hw=inv_hw),
        out_shape=jax.ShapeDtypeStruct((N, C, 1), jnp.float32),
        grid=(N, S),
        in_specs=[pl.BlockSpec((1, C, T), lambda n, s: (n, 0, s))]
                 + weight_specs(2),
        out_specs=pl.BlockSpec((1, C, 1), lambda n, s: (n, 0, 0)),
        compiler_params=pltpu.CompilerParams(
            dimension_semantics=("parallel", "arbitrary"),
            vmem_limit_bytes=_vmem_limit(2 * tile_bytes + 2 * w_bytes
                                         + 16 * C)),
        cost_estimate=pl.CostEstimate(
            flops=int(N * (C * HW + 4 * C * Cmid)),
            transcendentals=0,
            bytes_accessed=int(N * slab_bytes + 4 * N * C + w_bytes)),
    )(x3, w1t, b1_2d, w2t, b2_2d)

    out3 = pl.pallas_call(
        _mul_kernel,
        out_shape=jax.ShapeDtypeStruct((N, C, HW), x.dtype),
        grid=(N, S),
        in_specs=[
            pl.BlockSpec((1, C, T), lambda n, s: (n, 0, s)),
            pl.BlockSpec((1, C, 1), lambda n, s: (n, 0, 0)),
        ],
        out_specs=pl.BlockSpec((1, C, T), lambda n, s: (n, 0, s)),
        compiler_params=pltpu.CompilerParams(
            dimension_semantics=("parallel", "parallel"),
            vmem_limit_bytes=_vmem_limit(4 * tile_bytes + 16 * C)),
        cost_estimate=pl.CostEstimate(
            flops=int(N * C * HW),
            transcendentals=0,
            bytes_accessed=int(2 * N * slab_bytes + 4 * N * C)),
    )(x3, gate)

    return out3.reshape(N, C, H, W)


def se_ref(x, w1, b1, w2, b2):
    """Pure-JAX reference mirroring the PyTorch module."""
    pooled = jnp.mean(x, axis=(2, 3))                       # (N, C)
    h = jnp.maximum(pooled @ w1.T + b1, 0.0)                # (N, Cmid)
    y = h @ w2.T + b2                                       # (N, C)
    return x * y[:, :, None, None]


if __name__ == "__main__":
    N, C, H, W = 2, 4, 16, 16
    reduction = 1
    Cmid = C // reduction

    key = jax.random.PRNGKey(0)
    k_x, k_w1, k_b1, k_w2, k_b2 = jax.random.split(key, 5)

    x = jax.random.normal(k_x, (N, C, H, W), dtype=jnp.float32)
    # Deterministic synthetic parameters (shapes match nn.Conv2d 1x1 w/ bias).
    w1 = 0.1 * jax.random.normal(k_w1, (Cmid, C), dtype=jnp.float32)
    b1 = 0.05 * jax.random.normal(k_b1, (Cmid,), dtype=jnp.float32)
    w2 = 0.1 * jax.random.normal(k_w2, (C, Cmid), dtype=jnp.float32)
    b2 = 0.05 * jax.random.normal(k_b2, (C,), dtype=jnp.float32)

    ref = se_ref(x, w1, b1, w2, b2)

    # Auto path (fused single-pass kernel for this slab size).
    out_fused = jax.block_until_ready(se_module(x, w1, b1, w2, b2))
    assert out_fused.shape == (N, C, H, W)
    assert jnp.allclose(out_fused, ref, atol=1e-5, rtol=1e-5), \
        "fused path mismatch vs reference"

    # Also exercise the split (pool+excite / multiply) fallback path.
    out_split = jax.block_until_ready(se_module(x, w1, b1, w2, b2, fuse=False))
    assert jnp.allclose(out_split, ref, atol=1e-5, rtol=1e-5), \
        "split path mismatch vs reference"

    print("KERNEL_OK")
</pallas_src>

<mosaic_0001>
module attributes {stable_mosaic.version = 11 : i64} {
  func.func @_fused_kernel(%arg0: i32, %arg1: memref<1x4x256xf32, #tpu.memory_space<vmem>>, %arg2: memref<4x4xf32, #tpu.memory_space<vmem>>, %arg3: memref<1x4xf32, #tpu.memory_space<vmem>>, %arg4: memref<4x4xf32, #tpu.memory_space<vmem>>, %arg5: memref<1x4xf32, #tpu.memory_space<vmem>>, %arg6: memref<1x4x256xf32, #tpu.memory_space<vmem>>) attributes {dimension_semantics = [#tpu.dimension_semantics<parallel>], iteration_bounds = array<i64: 2>, scalar_prefetch = 0 : i64, scratch_operands = 0 : i64, tpu.core_type = #tpu.core_type<tc>, window_params = [{transform_indices = @transform_0, window_bounds = array<i64: 1, 4, 256>}, {pipeline_mode = #tpu.pipeline_mode<synchronous>, transform_indices = @transform_1, window_bounds = array<i64: 4, 4>}, {pipeline_mode = #tpu.pipeline_mode<synchronous>, transform_indices = @transform_2, window_bounds = array<i64: 1, 4>}, {pipeline_mode = #tpu.pipeline_mode<synchronous>, transform_indices = @transform_3, window_bounds = array<i64: 4, 4>}, {pipeline_mode = #tpu.pipeline_mode<synchronous>, transform_indices = @transform_4, window_bounds = array<i64: 1, 4>}, {transform_indices = @transform_5, window_bounds = array<i64: 1, 4, 256>}]} {
    %c0 = arith.constant 0 : index
    %c0_0 = arith.constant 0 : index
    %c0_1 = arith.constant 0 : index
    %0 = vector.load %arg1[%c0, %c0_0, %c0_1] : memref<1x4x256xf32, #tpu.memory_space<vmem>>, vector<1x4x256xf32>
    %cst = arith.constant dense<0.000000e+00> : vector<1x4xf32>
    %1 = vector.multi_reduction <add>, %0, %cst [2] : vector<1x4x256xf32> to vector<1x4xf32>
    %cst_2 = arith.constant 3.906250e-03 : f32
    %2 = vector.broadcast %cst_2 : f32 to vector<1x4xf32>
    %3 = arith.mulf %1, %2 : vector<1x4xf32>
    %c0_3 = arith.constant 0 : index
    %c0_4 = arith.constant 0 : index
    %4 = vector.load %arg2[%c0_3, %c0_4] : memref<4x4xf32, #tpu.memory_space<vmem>>, vector<4x4xf32>
    %cst_5 = arith.constant dense<0.000000e+00> : vector<1x4xf32>
    %5 = tpu.matmul %3, %4, %cst_5 {dimension_numbers = #tpu.dot_dimension_numbers<[1], [0], [0], [1], [0, 0, 1, 1], [], []>} : vector<1x4xf32>, vector<4x4xf32>, vector<1x4xf32> -> vector<1x4xf32>
    %c0_6 = arith.constant 0 : index
    %c0_7 = arith.constant 0 : index
    %6 = vector.load %arg3[%c0_6, %c0_7] : memref<1x4xf32, #tpu.memory_space<vmem>>, vector<1x4xf32>
    %7 = arith.addf %5, %6 : vector<1x4xf32>
    %cst_8 = arith.constant 0.000000e+00 : f32
    %8 = vector.broadcast %cst_8 : f32 to vector<1x4xf32>
    %9 = arith.maximumf %7, %8 : vector<1x4xf32>
    %c0_9 = arith.constant 0 : index
    %c0_10 = arith.constant 0 : index
    %10 = vector.load %arg4[%c0_9, %c0_10] : memref<4x4xf32, #tpu.memory_space<vmem>>, vector<4x4xf32>
    %cst_11 = arith.constant dense<0.000000e+00> : vector<1x4xf32>
    %11 = tpu.matmul %9, %10, %cst_11 {dimension_numbers = #tpu.dot_dimension_numbers<[1], [0], [0], [1], [0, 0, 1, 1], [], []>} : vector<1x4xf32>, vector<4x4xf32>, vector<1x4xf32> -> vector<1x4xf32>
    %c0_12 = arith.constant 0 : index
    %c0_13 = arith.constant 0 : index
    %12 = vector.load %arg5[%c0_12, %c0_13] : memref<1x4xf32, #tpu.memory_space<vmem>>, vector<1x4xf32>
    %13 = arith.addf %11, %12 : vector<1x4xf32>
    %14 = vector.shape_cast %13 : vector<1x4xf32> to vector<1x4x1xf32>
    %15 = vector.broadcast %14 : vector<1x4x1xf32> to vector<1x4x256xf32>
    %16 = arith.mulf %0, %15 : vector<1x4x256xf32>
    %c0_14 = arith.constant 0 : index
    %c0_15 = arith.constant 0 : index
    %c0_16 = arith.constant 0 : index
    %17 = vector.load %arg6[%c0_14, %c0_15, %c0_16] : memref<1x4x256xf32, #tpu.memory_space<vmem>>, vector<1x4x256xf32>
    tpu.vector_store %arg6[%c0_14, %c0_15, %c0_16], %16 {strides = array<i32>} : memref<1x4x256xf32, #tpu.memory_space<vmem>>, vector<1x4x256xf32>,
    return
  }
  func.func @transform_0(%arg0: i32) -> (i32, i32, i32) {
    %c0_i32 = arith.constant 0 : i32
    %c0_i32_0 = arith.constant 0 : i32
    %c0_i32_1 = arith.constant 0 : i32
    return %arg0, %c0_i32, %c0_i32_0 : i32, i32, i32
  }
  func.func @transform_1(%arg0: i32) -> (i32, i32) {
    %c0_i32 = arith.constant 0 : i32
    %c0_i32_0 = arith.constant 0 : i32
    %c0_i32_1 = arith.constant 0 : i32
    return %c0_i32, %c0_i32_0 : i32, i32
  }
  func.func @transform_2(%arg0: i32) -> (i32, i32) {
    %c0_i32 = arith.constant 0 : i32
    %c0_i32_0 = arith.constant 0 : i32
    %c0_i32_1 = arith.constant 0 : i32
    return %c0_i32, %c0_i32_0 : i32, i32
  }
  func.func @transform_3(%arg0: i32) -> (i32, i32) {
    %c0_i32 = arith.constant 0 : i32
    %c0_i32_0 = arith.constant 0 : i32
    %c0_i32_1 = arith.constant 0 : i32
    return %c0_i32, %c0_i32_0 : i32, i32
  }
  func.func @transform_4(%arg0: i32) -> (i32, i32) {
    %c0_i32 = arith.constant 0 : i32
    %c0_i32_0 = arith.constant 0 : i32
    %c0_i32_1 = arith.constant 0 : i32
    return %c0_i32, %c0_i32_0 : i32, i32
  }
  func.func @transform_5(%arg0: i32) -> (i32, i32, i32) {
    %c0_i32 = arith.constant 0 : i32
    %c0_i32_0 = arith.constant 0 : i32
    %c0_i32_1 = arith.constant 0 : i32
    return %arg0, %c0_i32, %c0_i32_0 : i32, i32, i32
  }
}

</mosaic_0001>

<bundles_post_ra>
// kernel: tpu_custom_call.1
= control target key start
LH: loop header
LB: loop body
LE: loop exit
PB: predicated region body
PF: predicated region fallthrough
CT: control target
= control target key end

     0   :  { %10 = vsyncpa [#allocation3], 0  ;;  %s1023_s0 = inlined_call_operand.hbm [shape: f32[2,4,256], index: 0, kind: input, shape index: {}]   ;;  %s1024_s1 = inlined_call_operand.hbm [shape: f32[4,4], index: 1, kind: input, shape index: {}]   ;;  %s1025_s2 = inlined_call_operand.vmem [shape: f32[1,4], index: 2, kind: input, shape index: {}]   ;;  %s1026_s3 = inlined_call_operand.vmem [shape: f32[4,4], index: 3, kind: input, shape index: {}]   ;;  %s1027_s4 = inlined_call_operand.vmem [shape: f32[1,4], index: 4, kind: input, shape index: {}]   ;;  %s1028_s5 = inlined_call_operand.hbm [shape: f32[2,4,256], index: 5, kind: output, shape index: {}]  }
   0x1   :  { %12 = vsyncpa [#allocation3 + $0x1], 0 }
   0x2   :  { %13 = vsyncpa [#allocation6], 0 }
   0x3   :  { %14 = vsyncpa [#allocation4], 0 }
   0x4   :  { %16 = vsyncpa [#allocation4 + $0x1], 0  ;;  %s805_s18 = smov 0   ;;  %s807_s19 = smov 0  }
   0x5   :  { %s809_s20 = smov 0   ;;  %s811_s21 = smov 0  }
   0x6 LB: > { %s826_s22 = sadd.s32 4294967295, %s767_s21   ;;  %s542_s23 = sadd.s32 4294967294, %s767_s21   ;;  %s767_s21 = sphi %s811_s21, %s1052_s21   ;;  %s763_s20 = sphi %s809_s20, %s1051_s20   ;;  %s759_s19 = sphi %s807_s19, %s1050_s19   ;;  %s755_s18 = sphi %s805_s18, %s1049_s18  }
   0x7   : > { %p42_p0 = scmp.ne.s32.totalorder %s759_s19, %s755_s18  ;;  %p1029_p1 = scmp.eq.s32.totalorder %s826_s22, 0 }
   0x8   : > { %p156_p3 = scmp.eq.s32.totalorder %s542_s23, 1  ;;  %p543_p5 = scmp.ge.s32.totalorder %s767_s21, 1 }
   0x9   : > { %p835_p4 = por %p1029_p1, %p42_p0  ;;  %p163_p7 = scmp.lt.s32.totalorder %s767_s21, 3 }
   0xa   : > { %p840_p6 = por %p156_p3, %p42_p0  ;;  %s769_s27 = smov [#allocation5]  }
   0xb   : > { %s1032_s24 = scalar_select %p835_p4, 1, 0 }
   0xc   : > { %s1033_s25 = scalar_select %p840_p6, 1, 0 }
   0xd   : > { %p845_p8 = pnand %p543_p5, %p163_p7  ;;  %s176_s28 = sshll.u32 %s769_s27, 4  ;;  %s177_s28 = int_to_ptr.vmem [resolvable:$true] %s176_s28 }
   0xe   : > { %s853_s29 = sadd.s32 1, %s767_s21   ;;  %s29_s8 = sadd.s32 1, %s763_s20 }
   0xf   : > { %s1034_s26 = scalar_select %p845_p8, 1, 0 }
  0x10   : > { %p586_p10 = pneg %p845_p8  ;;  %s26_s6 = ssub.s32 %s767_s21, %s853_s29 }
  0x11   : > { %p863_p12 = scmp.eq.s32.totalorder %s26_s6, 0  ;;  %s639_s11 = scalar_lea.hbm %s1024_s1, 64 }
  0x12   : > { %p857_p11 = pnand %p586_p10, %p1029_p1  ;;  %p640_p0 = scmp.ne.s32.totalorder %s1024_s1, %s639_s11 }
  0x13   : > { %s1036_s7 = scalar_select %p863_p12, 1, 0 }
  0x14   : > { %p641_p3 = pneg %p857_p11  ;;  %p646_p10 = scmp.lt.u32.totalorder %s639_s11, %s1024_s1 }
  0x16   : > { %p642_p5 = pnand %p641_p3, %p640_p0 }
  0x18   : > { %p643_p7 = pneg %p642_p5 }
  0x1a   : > { %p648_p9 = pnand %p646_p10, %p643_p7 }
  0x1c   : > { %651 = shalt.err (!%p648_p9)
}
  0x1d   : > { %s652_s16 = scalar_lea.vmem %s177_s28, 64  ;;  %p660_p6 = scmp.lt.s32.totalorder %s177_s28, %s177_s28 }
  0x1e   : > { %p653_p1 = scmp.ne.s32.totalorder %s177_s28, %s652_s16  ;;  %p661_p4 = scmp.lt.s32.totalorder %s652_s16, %s652_s16 }
  0x20   : > { %p655_p2 = pnand %p653_p1, %p641_p3  ;;  %p662_p8 = por %p661_p4, %p660_p6 }
  0x22   : > { %p656_p13 = pneg %p655_p2 }
  0x24   : > { %p663_p12 = pnand %p662_p8, %p656_p13 }
  0x26   : > { %666 = shalt.err (!%p663_p12)
}
  0x27   : > { %589 = dma.hbm_to_vmem [thread:$0]  (!%p857_p11), %s1024_s1, 64, %s177_s28, [#allocation6]  }
  0x28   : > { %p1037_p1 = scmp.ne.s32.totalorder %s1036_s7, 0  ;;  %p37_p2 = scmp.eq.s32.totalorder %s767_s21, 0 }
  0x29   : > { %p1038_p4 = scmp.ne.s32.totalorder %s763_s20, %s759_s19  ;;  %p1039_p6 = scmp.eq.s32.totalorder %s826_s22, 1 }
  0x2a   : > { %s889_s27 = scalar_select %p1037_p1, %s763_s20, %s29_s8  }
  0x2b   : > { %p897_p8 = por %p1039_p6, %p1038_p4  ;;  %p599_p9 = scmp.lt.s32.totalorder %s767_s21, 2 }
  0x2c   : > { %s196_s6 = sand.u32 1, %s763_s20   ;;  %p1041_p12 = pmov %p1038_p4 }
  0x2d   : > { %s546_s9 = sshll.u32 %s196_s6, 3  ;;  %s562_s10 = sshll.u32 %s767_s21, 7 }
  0x2e   : > { %p38_p13 = por %p37_p2, %p1041_p12  ;;  %s910_s28 = scalar_lea.hbm %s1023_s0, %s562_s10 }
  0x2f   : > { %s200_s7 = scalar_lea.vmem [#allocation2], %s546_s9  ;;  %s197_s14 = scalar_lea.sflag [#allocation3], %s196_s6 }
  0x30   : > { %s208_s8 = sshll.u32 %s200_s7, 4  ;;  %p912_p11 = pnand %p599_p9, %p38_p13  ;;  %s916_s8 = int_to_ptr.vmem [resolvable:$true] %s208_s8 }
  0x31   : > { %s667_s15 = scalar_lea.hbm %s910_s28, 128  ;;  %s672_s23 = scalar_lea.hbm %s1023_s0, 256 }
  0x32   : > { %p668_p0 = scmp.ne.s32.totalorder %s910_s28, %s667_s15  ;;  %p669_p3 = pneg %p912_p11 }
  0x33   : > { %p673_p10 = scmp.lt.u32.totalorder %s910_s28, %s1023_s0  ;;  %p674_p1 = scmp.lt.u32.totalorder %s672_s23, %s667_s15 }
  0x34   : > { %p670_p5 = pnand %p669_p3, %p668_p0  ;;  %p676_p4 = scmp.lt.u32.totalorder %s667_s15, %s910_s28 }
  0x35   : > { %p675_p2 = por %p674_p1, %p673_p10 }
  0x36   : > { %p671_p7 = pneg %p670_p5 }
  0x37   : > { %p677_p6 = por %p676_p4, %p675_p2 }
  0x39   : > { %p678_p9 = pnand %p677_p6, %p671_p7 }
  0x3b   : > { %681 = shalt.err (!%p678_p9)
}
  0x3c   : > { %s682_s6 = scalar_lea.vmem %s916_s8, 128  ;;  %s770_s11 = smov [#allocation2]  }
  0x3d   : > { %p683_p12 = scmp.ne.s32.totalorder %s916_s8, %s682_s6  ;;  %s687_s12 = sshll.u32 %s770_s11, 4  ;;  %s688_s12 = int_to_ptr.vmem [resolvable:$false] %s687_s12 }
  0x3e   : > { %s689_s7 = scalar_lea.vmem %s688_s12, 256  ;;  %p690_p5 = scmp.lt.s32.totalorder %s916_s8, %s688_s12 }
  0x3f   : > { %p685_p13 = pnand %p683_p12, %p669_p3  ;;  %p691_p10 = scmp.lt.s32.totalorder %s689_s7, %s682_s6 }
  0x41   : > { %p686_p0 = pneg %p685_p13  ;;  %p692_p1 = por %p691_p10, %p690_p5 }
  0x43   : > { %p693_p2 = pnand %p692_p1, %p686_p0 }
  0x45   : > { %696 = shalt.err (!%p693_p2)
}
  0x46   : > { %593 = dma.hbm_to_vmem [thread:$0]  (!%p912_p11), %s910_s28, 128, %s916_s8, %s197_s14  }
  0x47   : > { %p1043_p7 = scmp.ne.s32.totalorder %s1034_s26, 0 }
  0x48   : > { %s946_s15 = sand.u32 (!%p1043_p7), 1, %s759_s19   ;;  %p1044_p3 = scmp.ne.s32.totalorder (!%p1043_p7), %s1032_s24, 0 }
  0x49   : > { %217 = sbr.rel (%p1043_p7) target bundleno = 801 (0x321), region = 40  ;;  %s550_s16 = sshll.u32 (!%p1043_p7), %s946_s15, 3 }
  0x4a   : > { %s220_s17 = scalar_lea.sflag (!%p1043_p7), [#allocation3], %s946_s15  ;;  %s223_s23 = scalar_lea.vmem (!%p1043_p7), [#allocation2], %s550_s16 }
  0x50   : > { %742 = dma.done.wait (%p1044_p3), %s220_s17, 128  }
  0x51   : > { %744 = vsyncadd (%p1044_p3), %s220_s17, 4294967168  ;;  %p1045_p11 = scmp.eq.s32.totalorder %s826_s22, 0 }
  0x53   : > { %746 = dma.done.wait (%p1045_p11), [#allocation6], 64   ;;  %p1046_p4 = pmov %p1045_p11 }
  0x54   : > { %vm258_vm0 = vcmask 1043456   ;;  %v254_v0 = vld [vmem:[%s223_s23] sm:$0xff]  ;;  %v771_v5 = vmov 0.0   ;;  %v265_v6 = vld [vmem:[#allocation5] sm:$0xf]  ;;  %vm772_vm1 = vmmov 0   ;;  %v268_v7 = vlaneseq }
  0x55   : > { %748 = vsyncadd (%p1046_p4), [#allocation6], 4294967232  ;;  %v256_v1 = vcombine.high %v254_v0, %v254_v0  ;;  %v259_v2 = vsel %vm258_vm0, %v254_v0, 0.0  ;;  %568 = vmatprep.subr.mxu0 %v771_v5  ;;  %573 = vmatprep.subr.mxu1 %v771_v5  ;;  %vm274_vm2 = vcmask 31744   ;;  %v351_v14 = vld [vmem:[%s1026_s3] sm:$0xf] }
  0x56   : > { %569 = vmatpush3.msk.msra.mxu0 %vm258_vm0, %v265_v6  ;;  %570 = vmatprep.mubr.msk.f32.mxu0 %vm772_vm1, %v771_v5  ;;  %v269_v8 = vand.u32 127, %v268_v7  ;;  %v271_v9 = vshrl.u32 %v268_v7, 7  ;;  %v266_v15 = vld [vmem:[%s1025_s2] sm:$0x1]  ;;  %v773_v26 = vmov 839922192  }
  0x57   : > { %v260_v3 = vsel %vm258_vm0, %v256_v1, 0.0  ;;  %575 = vmatprep.mubr.msk.f32.mxu1 %vm772_vm1, %v771_v5  ;;  %574 = vmatpush3.msk.msra.mxu1 %vm258_vm0, %v351_v14  ;;  %v352_v20 = vld [vmem:[%s1027_s4] sm:$0x1]  ;;  %v438_v27 = vunpack.c.l.s4 %v773_v26  ;;  %s563_s9 = sshll.u32 %s826_s22, 7  ;;  %s253_s10 = scalar_lea.vmem [#allocation7], %s550_s16 }
  0x58   : > { %v261_v4 = vadd.f32 %v260_v3, %v259_v2  ;;  %v272_v10 = vsub.s32 %v269_v8, %v271_v9  ;;  %v431_v21 = vsub.s32 0, %v271_v9  ;;  %s462_s6 = sshll.u32 %s253_s10, 4  ;;  %s979_s7 = scalar_lea.hbm %s1028_s5, %s563_s9  ;;  %s981_s6 = int_to_ptr.vmem [resolvable:$true] %s462_s6 }
  0x59   : > { %v439_v28 = vunpack.c.0.s8 %v438_v27  ;;  %s448_s17 = scalar_lea.sflag [#allocation4], %s946_s15  ;;  %s697_s23 = scalar_lea.vmem %s981_s6, 128 }
  0x5a   : > { %262 = vadd.xlane.f32.xlu0 %v261_v4  ;;  %p698_p6 = scmp.ne.s32.totalorder %s981_s6, %s697_s23  ;;  %s774_s22 = smov [#allocation7]  }
  0x5b   : > { %v442_v29 = vsub.s32 %v439_v28, %v271_v9  ;;  %s701_s16 = sshll.u32 %s774_s22, 4  ;;  %s702_s16 = int_to_ptr.vmem [resolvable:$false] %s701_s16 }
  0x5c   : > { %p699_p9 = pnand %p698_p6, %p897_p8  ;;  %s703_s24 = scalar_lea.vmem %s702_s16, 256 }
  0x5d   : > { %p704_p13 = scmp.lt.s32.totalorder %s981_s6, %s702_s16  ;;  %p705_p0 = scmp.lt.s32.totalorder %s703_s24, %s697_s23 }
  0x5e   : > { %p700_p12 = pneg %p699_p9 }
  0x5f   : > { %p706_p5 = por %p705_p0, %p704_p13 }
  0x61   : > { %p707_p10 = pnand %p706_p5, %p700_p12 }
  0xe7   : > { %v263_v11 = vpop.xlane.xlu0 %262 }
  0xe8   : > { %v264_v12 = vmul.f32 0.00390625, %v263_v11 }
  0xea   : > { %v273_v13 = vrot.slane %v264_v12, %v272_v10 }
  0xec   : > { %571 = vmatmul.mubr.msk.f32.vlgmr.msra.gmra.mrb[0].mxu0 %vm274_vm2, %v273_v13 }
 0x1bf   : > { %v346_v16 = vpop.f32.mrb[0].mxu0 }
 0x1c0   : > { %v347_v17 = vadd.f32 %v346_v16, %v266_v15  ;;  %v572_v18 = vpop.f32.mrb[1].mxu0 }
 0x1c2   : > { %v350_v19 = vmax.f32 %v347_v17, 0.0 }
 0x1c4   : > { %576 = vmatmul.mubr.msk.f32.vlgmr.msra.gmra.mrb[0].mxu1 %vm274_vm2, %v350_v19 }
 0x297   : > { %v425_v22 = vpop.f32.mrb[0].mxu1 }
 0x298   : > { %v426_v23 = vadd.f32 %v425_v22, %v352_v20  ;;  %v577_v24 = vpop.f32.mrb[1].mxu1 }
 0x29a   : > { %v432_v25 = vrot.slane %v426_v23, %v431_v21 }
 0x29c   : > { %434 = vbcast.lane.b32.xlu0 %v432_v25, 256 }
 0x30e   : > { %v435_v30 = vpop.permute.xlu0 %434 }
 0x30f   : > { %v443_v31 = vrot.slane %v435_v30, %v442_v29 }
 0x311   : > { %v445_v32 = vmul.f32 %v443_v31, %v254_v0 }
 0x313   : > { %446 = vst [vmem:[%s253_s10] sm:$0xff] %v445_v32 }
 0x314   : > { %710 = shalt.err (!%p707_p10)
}
 0x315   : > { %s711_s15 = scalar_lea.hbm %s979_s7, 128  ;;  %s715_s8 = scalar_lea.hbm %s1028_s5, 256 }
 0x316   : > { %p712_p1 = scmp.ne.s32.totalorder %s979_s7, %s711_s15  ;;  %p716_p3 = scmp.lt.u32.totalorder %s979_s7, %s1028_s5 }
 0x317   : > { %p717_p11 = scmp.lt.u32.totalorder %s715_s8, %s711_s15  ;;  %p719_p6 = scmp.lt.u32.totalorder %s711_s15, %s979_s7 }
 0x318   : > { %p713_p2 = pnand %p712_p1, %p897_p8 }
 0x319   : > { %p718_p4 = por %p717_p11, %p716_p3 }
 0x31a   : > { %p714_p7 = pneg %p713_p2 }
 0x31b   : > { %p720_p9 = por %p719_p6, %p718_p4 }
 0x31d   : > { %p721_p12 = pnand %p720_p9, %p714_p7 }
 0x31f   : > { %724 = shalt.err (!%p721_p12)
}
 0x320   : > { %584 = dma.vmem_to_hbm [thread:$0]  (%p897_p8), %s981_s6, 128, %s979_s7, %s448_s17  }
 0x321 PF: > { %s474_s9 = sand.u32 1, %s755_s18   ;;  %p1047_p13 = scmp.ne.s32.totalorder %s1033_s25, 0 }
 0x322   : > { %p1048_p0 = scmp.ge.s32.totalorder %s767_s21, 2  ;;  %s475_s10 = scalar_lea.sflag [#allocation4], %s474_s9 }
 0x324   : > { %p595_p5 = pnand %p1048_p0, %p1047_p13 }
 0x326   : > { %750 = dma.done.wait (!%p595_p5), %s475_s10, 128  }
 0x327   : > { %752 = vsyncadd (!%p595_p5), %s475_s10, 4294967168  ;;  %p19_p10 = scmp.ge.s32.totalorder %s853_s29, 4   ;;  %s1049_s18 = smov %s759_s19 }
 0x328   : > { %s1050_s19 = smov %s763_s20  ;;  %s1051_s20 = smov %s889_s27 }
 0x329   : > { %s1052_s21 = smov %s853_s29  ;;  %21 = sbr.rel (!%p19_p10) target bundleno = 6 (0x6), region = 89 }
 0x330   :  { %480 = vsyncpa [#allocation3], 1 }
 0x331   :  { %482 = vsyncpa [#allocation3 + $0x1], 1 }
 0x332   :  { %483 = vsyncpa [#allocation6], 1 }
 0x333   :  { %484 = vsyncpa [#allocation4], 1 }
 0x334   :  { %486 = vsyncpa [#allocation4 + $0x1], 1 }

</bundles_post_ra>
